<compile_context>
chip_gen: v5e
topology: v5e:2x2
jax: 0.10.0
libtpu: 0.0.40
codegen_flags: <defaults>
</compile_context>

<pallas_src>
import functools

import jax
import jax.numpy as jnp
from jax.experimental import pallas as pl
from jax.experimental.pallas import tpu as pltpu


def _se_kernel(x_ref,       # (B, C, HW_pad) activation block
               params_ref,  # (C+1, C+Csq)   packed [w1_t | w2 | b2-row | b1-row]
               out_ref,     # (B, C, HW_pad)
               *, c, csq, inv_hw):
    # ---- Squeeze: global average pool over H*W (zero padding excluded via inv_hw).
    x_pool = x_ref[...]
    if x_pool.dtype != jnp.float32:
        x_pool = x_pool.astype(jnp.float32)          # f32 accumulation (bf16 inputs)
    pooled = jnp.sum(x_pool, axis=-1) * inv_hw       # (B, C)

    # ---- Unpack the single packed parameter operand (static slices, tiny).
    w1_t = params_ref[0:c, 0:csq]                    # (C, Csq)  fc1 weight, column form
    w2 = params_ref[0:c, csq:2 * csq]                # (C, Csq)  fc2 weight (PyTorch layout)
    b2 = params_ref[c:c + 1, 0:c]                    # (1, C)
    b1 = params_ref[c:c + 1, c:c + csq]              # (1, Csq)

    # ---- fc1 + SiLU: broadcast-multiply + sublane (channel) reduction. VPU/XLU only.
    h1 = jnp.sum(pooled[:, :, None] * w1_t[None, :, :], axis=1) + b1   # (B, Csq)
    h1 = h1 * jax.nn.sigmoid(h1)                                       # SiLU

    # ---- fc2 + Sigmoid: broadcast-multiply + lane (squeeze) reduction.
    h2 = jnp.sum(h1[:, None, :] * w2[None, :, :], axis=-1) + b2        # (B, C)
    gate = jax.nn.sigmoid(h2)[:, :, None]                              # (B, C, 1)

    # ---- Excite: re-read x_ref (fresh streamed load) so the big block is never
    #      held live across the pool->fc1->fc2 chain (no vreg spills).
    out_ref[...] = (x_ref[...] * gate).astype(out_ref.dtype)


def squeeze_excitation_pallas(x_nchw, w1, b1, w2, b2):
    """SqueezeExcitation forward.

    Args:
      x_nchw: (N, expand_c, H, W) input (PyTorch NCHW layout), f32 or bf16.
      w1: (squeeze_c, expand_c)  fc1 1x1-conv weight (PyTorch (O,I,1,1) squeezed).
      b1: (squeeze_c,)           fc1 bias.
      w2: (expand_c, squeeze_c)  fc2 1x1-conv weight.
      b2: (expand_c,)            fc2 bias.
    Returns:
      (N, expand_c, H, W), same dtype as x.
    """
    N, C, H, W = x_nchw.shape
    Csq = w1.shape[0]
    HW = H * W
    HW_pad = ((HW + 127) // 128) * 128   # lane-dense stores (vst, not vst.msk)

    # Contiguous dim-merge (free); zero-pad H*W only when not a multiple of 128.
    x = x_nchw.reshape(N, C, HW)
    if HW_pad != HW:
        x = jnp.pad(x, ((0, 0), (0, 0), (0, HW_pad - HW)))

    # ---- Choose images-per-block B.
    # in + out, each double-buffered => ~4x block bytes of scoped VMEM.  Stay
    # under ~8 MiB total: safe below the default scoped-VMEM limit on every
    # generation (v5e 16 MiB, v6e 32 MiB, v7x 32 MiB of 64 MiB physical).
    itemsize = x.dtype.itemsize
    bytes_per_image = C * HW_pad * itemsize
    vmem_budget = 8 * 1024 * 1024
    b_max = max(1, vmem_budget // (4 * bytes_per_image))
    B = int(min(N, b_max))
    if N >= 2:
        # Keep at least 2 "parallel" grid steps so both v7x TensorCores get work.
        B = min(B, -(-N // 2))
    B = max(B, 1)
    grid_n = pl.cdiv(N, B)
    N_pad = grid_n * B
    if N_pad != N:
        x = jnp.pad(x, ((0, N_pad - N), (0, 0), (0, 0)))

    # ---- Pack the four tiny weight/bias tensors into one operand (single DMA).
    #   rows 0..C-1:  [ w1_t (C,Csq) | w2 (C,Csq) | 0 ... ]
    #   row  C:       [ b2 (C,)                   | b1 (Csq,) ]
    Wp = C + Csq                       # >= 2*Csq for any real SE block (C >= Csq)
    params = jnp.zeros((C + 1, Wp), jnp.float32)
    params = params.at[:C, 0:Csq].set(jnp.transpose(w1).astype(jnp.float32))
    params = params.at[:C, Csq:2 * Csq].set(w2.astype(jnp.float32))
    params = params.at[C, 0:C].set(b2.astype(jnp.float32))
    params = params.at[C, C:C + Csq].set(b1.astype(jnp.float32))

    kernel = functools.partial(_se_kernel, c=C, csq=Csq, inv_hw=float(1.0 / HW))

    out = pl.pallas_call(
        kernel,
        out_shape=jax.ShapeDtypeStruct((N_pad, C, HW_pad), x.dtype),
        grid=(grid_n,),
        in_specs=[
            pl.BlockSpec((B, C, HW_pad), lambda n: (n, 0, 0)),
            # Constant index_map: Pallas skips re-copying a block whose index is
            # unchanged between consecutive grid steps -> params DMA'd once.
            pl.BlockSpec((C + 1, Wp), lambda n: (0, 0)),
        ],
        out_specs=pl.BlockSpec((B, C, HW_pad), lambda n: (n, 0, 0)),
        compiler_params=pltpu.CompilerParams(
            dimension_semantics=("parallel",)),
    )(x, params)

    out = out[:N, :, :HW]
    return out.reshape(N, C, H, W)


def _reference_nchw(x_nchw, w1, b1, w2, b2):
    """Independent pure-JAX reference of the PyTorch forward."""
    pooled = jnp.mean(x_nchw.astype(jnp.float32), axis=(2, 3))   # adaptive_avg_pool2d
    h1 = pooled @ w1.T + b1                                      # fc1 (1x1 conv)
    h1 = h1 * jax.nn.sigmoid(h1)                                 # SiLU
    h2 = h1 @ w2.T + b2                                          # fc2 (1x1 conv)
    gate = jax.nn.sigmoid(h2)                                    # Sigmoid
    return (x_nchw * gate[:, :, None, None].astype(x_nchw.dtype))


if __name__ == "__main__":
    # SqueezeExcitation(input_c=16, expand_c=64, squeeze_factor=4)
    #   -> squeeze_c = 16 // 4 = 4; x has expand_c = 64 channels.
    N, C, H, W = 2, 64, 16, 16
    Csq = 4

    key = jax.random.PRNGKey(0)
    k0, k1, k2, k3, k4 = jax.random.split(key, 5)

    x = jax.random.normal(k0, (N, C, H, W), jnp.float32)
    w1 = jax.random.normal(k1, (Csq, C), jnp.float32) * 0.1   # fc1.weight[:, :, 0, 0]
    b1 = jax.random.normal(k2, (Csq,), jnp.float32) * 0.1     # fc1.bias
    w2 = jax.random.normal(k3, (C, Csq), jnp.float32) * 0.1   # fc2.weight[:, :, 0, 0]
    b2 = jax.random.normal(k4, (C,), jnp.float32) * 0.1       # fc2.bias

    out = squeeze_excitation_pallas(x, w1, b1, w2, b2)
    out = jax.block_until_ready(out)

    ref = _reference_nchw(x, w1, b1, w2, b2)
    assert out.shape == (N, C, H, W)
    assert jnp.allclose(out, ref, atol=1e-4, rtol=1e-4), (
        float(jnp.max(jnp.abs(out - ref))))

    print("KERNEL_OK")
</pallas_src>

<mosaic_0001>
module attributes {stable_mosaic.version = 11 : i64} {
  func.func @_se_kernel(%arg0: i32, %arg1: memref<1x64x256xf32, #tpu.memory_space<vmem>>, %arg2: memref<65x68xf32, #tpu.memory_space<vmem>>, %arg3: memref<1x64x256xf32, #tpu.memory_space<vmem>>) attributes {dimension_semantics = [#tpu.dimension_semantics<parallel>], iteration_bounds = array<i64: 2>, scalar_prefetch = 0 : i64, scratch_operands = 0 : i64, tpu.core_type = #tpu.core_type<tc>, window_params = [{transform_indices = @transform_0, window_bounds = array<i64: 1, 64, 256>}, {pipeline_mode = #tpu.pipeline_mode<synchronous>, transform_indices = @transform_1, window_bounds = array<i64: 65, 68>}, {transform_indices = @transform_2, window_bounds = array<i64: 1, 64, 256>}]} {
    %c0 = arith.constant 0 : index
    %c0_0 = arith.constant 0 : index
    %c0_1 = arith.constant 0 : index
    %0 = vector.load %arg1[%c0, %c0_0, %c0_1] : memref<1x64x256xf32, #tpu.memory_space<vmem>>, vector<1x64x256xf32>
    %cst = arith.constant dense<0.000000e+00> : vector<1x64xf32>
    %1 = vector.multi_reduction <add>, %0, %cst [2] : vector<1x64x256xf32> to vector<1x64xf32>
    %cst_2 = arith.constant 3.906250e-03 : f32
    %2 = vector.broadcast %cst_2 : f32 to vector<1x64xf32>
    %3 = arith.mulf %1, %2 : vector<1x64xf32>
    %c0_3 = arith.constant 0 : index
    %c0_4 = arith.constant 0 : index
    %4 = vector.load %arg2[%c0_3, %c0_4] : memref<65x68xf32, #tpu.memory_space<vmem>>, vector<64x4xf32>
    %c0_5 = arith.constant 0 : index
    %c4 = arith.constant 4 : index
    %5 = vector.load %arg2[%c0_5, %c4] : memref<65x68xf32, #tpu.memory_space<vmem>>, vector<64x4xf32>
    %c64 = arith.constant 64 : index
    %c0_6 = arith.constant 0 : index
    %6 = vector.load %arg2[%c64, %c0_6] : memref<65x68xf32, #tpu.memory_space<vmem>>, vector<1x64xf32>
    %c64_7 = arith.constant 64 : index
    %c64_8 = arith.constant 64 : index
    %7 = vector.load %arg2[%c64_7, %c64_8] : memref<65x68xf32, #tpu.memory_space<vmem>>, vector<1x4xf32>
    %8 = vector.shape_cast %3 : vector<1x64xf32> to vector<1x64x1xf32>
    %9 = vector.shape_cast %4 : vector<64x4xf32> to vector<1x64x4xf32>
    %10 = vector.broadcast %8 : vector<1x64x1xf32> to vector<1x64x4xf32>
    %11 = arith.mulf %10, %9 : vector<1x64x4xf32>
    %cst_9 = arith.constant dense<0.000000e+00> : vector<1x4xf32>
    %12 = vector.multi_reduction <add>, %11, %cst_9 [1] : vector<1x64x4xf32> to vector<1x4xf32>
    %13 = arith.addf %12, %7 : vector<1x4xf32>
    %14 = arith.negf %13 : vector<1x4xf32>
    %15 = math.exp %14 : vector<1x4xf32>
    %cst_10 = arith.constant 1.000000e+00 : f32
    %16 = vector.broadcast %cst_10 : f32 to vector<1x4xf32>
    %17 = arith.addf %16, %15 : vector<1x4xf32>
    %18 = arith.divf %16, %17 : vector<1x4xf32>
    %19 = arith.mulf %13, %18 : vector<1x4xf32>
    %20 = vector.shape_cast %19 : vector<1x4xf32> to vector<1x1x4xf32>
    %21 = vector.shape_cast %5 : vector<64x4xf32> to vector<1x64x4xf32>
    %22 = vector.broadcast %20 : vector<1x1x4xf32> to vector<1x64x4xf32>
    %23 = arith.mulf %22, %21 : vector<1x64x4xf32>
    %cst_11 = arith.constant dense<0.000000e+00> : vector<1x64xf32>
    %24 = vector.multi_reduction <add>, %23, %cst_11 [2] : vector<1x64x4xf32> to vector<1x64xf32>
    %25 = arith.addf %24, %6 : vector<1x64xf32>
    %26 = arith.negf %25 : vector<1x64xf32>
    %27 = math.exp %26 : vector<1x64xf32>
    %cst_12 = arith.constant 1.000000e+00 : f32
    %28 = vector.broadcast %cst_12 : f32 to vector<1x64xf32>
    %29 = arith.addf %28, %27 : vector<1x64xf32>
    %30 = arith.divf %28, %29 : vector<1x64xf32>
    %31 = vector.shape_cast %30 : vector<1x64xf32> to vector<1x64x1xf32>
    %c0_13 = arith.constant 0 : index
    %c0_14 = arith.constant 0 : index
    %c0_15 = arith.constant 0 : index
    %32 = vector.load %arg1[%c0_13, %c0_14, %c0_15] : memref<1x64x256xf32, #tpu.memory_space<vmem>>, vector<1x64x256xf32>
    %33 = vector.broadcast %31 : vector<1x64x1xf32> to vector<1x64x256xf32>
    %34 = arith.mulf %32, %33 : vector<1x64x256xf32>
    %c0_16 = arith.constant 0 : index
    %c0_17 = arith.constant 0 : index
    %c0_18 = arith.constant 0 : index
    %35 = vector.load %arg3[%c0_16, %c0_17, %c0_18] : memref<1x64x256xf32, #tpu.memory_space<vmem>>, vector<1x64x256xf32>
    tpu.vector_store %arg3[%c0_16, %c0_17, %c0_18], %34 {strides = array<i32>} : memref<1x64x256xf32, #tpu.memory_space<vmem>>, vector<1x64x256xf32>,
    return
  }
  func.func @transform_0(%arg0: i32) -> (i32, i32, i32) {
    %c0_i32 = arith.constant 0 : i32
    %c0_i32_0 = arith.constant 0 : i32
    %c0_i32_1 = arith.constant 0 : i32
    return %arg0, %c0_i32, %c0_i32_0 : i32, i32, i32
  }
  func.func @transform_1(%arg0: i32) -> (i32, i32) {
    %c0_i32 = arith.constant 0 : i32
    %c0_i32_0 = arith.constant 0 : i32
    %c0_i32_1 = arith.constant 0 : i32
    return %c0_i32, %c0_i32_0 : i32, i32
  }
  func.func @transform_2(%arg0: i32) -> (i32, i32, i32) {
    %c0_i32 = arith.constant 0 : i32
    %c0_i32_0 = arith.constant 0 : i32
    %c0_i32_1 = arith.constant 0 : i32
    return %arg0, %c0_i32, %c0_i32_0 : i32, i32, i32
  }
}

</mosaic_0001>

<bundles_post_ra>
// kernel: tpu_custom_call.1
= control target key start
LH: loop header
LB: loop body
LE: loop exit
PB: predicated region body
PF: predicated region fallthrough
CT: control target
= control target key end

     0   :  { %7 = vsyncpa [#allocation3], 0  ;;  %s1335_s0 = inlined_call_operand.hbm [shape: f32[2,64,256], index: 0, kind: input, shape index: {}]   ;;  %s1336_s1 = inlined_call_operand.hbm [shape: f32[65,68], index: 1, kind: input, shape index: {}]   ;;  %s1337_s2 = inlined_call_operand.hbm [shape: f32[2,64,256], index: 2, kind: output, shape index: {}]  }
   0x1   :  { %9 = vsyncpa [#allocation3 + $0x1], 0 }
   0x2   :  { %10 = vsyncpa [#allocation6], 0 }
   0x3   :  { %11 = vsyncpa [#allocation4], 0 }
   0x4   :  { %13 = vsyncpa [#allocation4 + $0x1], 0  ;;  %s1044_s9 = smov 0   ;;  %s1046_s10 = smov 0  }
   0x5   :  { %s1048_s11 = smov 0   ;;  %s1050_s12 = smov 0  }
   0x6 LB: > { %s1065_s13 = sadd.s32 4294967295, %s1017_s12   ;;  %s746_s14 = sadd.s32 4294967294, %s1017_s12   ;;  %s1017_s12 = sphi %s1050_s12, %s1347_s12   ;;  %s1013_s11 = sphi %s1048_s11, %s1346_s11   ;;  %s1009_s10 = sphi %s1046_s10, %s1345_s10   ;;  %s1005_s9 = sphi %s1044_s9, %s1344_s9  }
   0x7   : > { %p39_p0 = scmp.ne.s32.totalorder %s1009_s10, %s1005_s9  ;;  %p40_p1 = scmp.eq.s32.totalorder %s1065_s13, 0 }
   0x8   : > { %p84_p2 = scmp.eq.s32.totalorder %s1065_s13, 1  ;;  %p90_p3 = scmp.eq.s32.totalorder %s746_s14, 1 }
   0x9   : > { %p1074_p4 = por %p40_p1, %p39_p0  ;;  %p747_p5 = scmp.ge.s32.totalorder %s1017_s12, 1 }
   0xa   : > { %p1079_p6 = por %p90_p3, %p39_p0  ;;  %p97_p7 = scmp.lt.s32.totalorder %s1017_s12, 3 }
   0xb   : > { %s108_s19 = sshll.u32 %s1336_s1, 4  ;;  %s1019_s21 = smov [#allocation5]   ;;  %s109_s19 = int_to_ptr.hbm [resolvable:$true] %s108_s19 }
   0xc   : > { %p1087_p8 = pnand %p747_p5, %p97_p7  ;;  %s110_s22 = sshll.u32 %s1019_s21, 4  ;;  %s111_s22 = int_to_ptr.vmem [resolvable:$true] %s110_s22 }
   0xd   : > { %s1097_s23 = sadd.s32 1, %s1017_s12   ;;  %s1020_s24 = smov 128  }
   0xe   : > { %p781_p9 = pneg %p1087_p8  ;;  %s1021_s25 = smov 8  }
   0xf   : > { %s23_s26 = ssub.s32 %s1017_s12, %s1097_s23  ;;  %s26_s27 = sadd.s32 1, %s1013_s11 }
  0x10   : > { %p782_p10 = pnand %p781_p9, %p40_p1  ;;  %p24_p12 = scmp.eq.s32.totalorder %s23_s26, 0 }
  0x11   : > { %p33_p13 = scmp.ne.s32.totalorder %s1013_s11, %s1009_s10  ;;  %p34_p0 = scmp.eq.s32.totalorder %s1017_s12, 0 }
  0x12   : > { %784 = dma.hbm_to_vmem [thread:$0]  (!%p782_p10), %s109_s19, 1152, %s111_s22, [#allocation6], %s1020_s24, %s1020_s24, %s1021_s25  }
  0x13   : > { %p794_p3 = scmp.lt.s32.totalorder %s1017_s12, 2  ;;  %p35_p5 = por %p34_p0, %p33_p13 }
  0x14   : > { %s1107_s28 = scalar_select %p24_p12, %s1013_s11, %s26_s27  }
  0x15   : > { %p1111_p7 = por %p84_p2, %p33_p13  ;;  %s124_s30 = sand.u32 1, %s1013_s11  }
  0x16   : > { %s771_s3 = sshll.u32 %s1017_s12, 7  ;;  %s750_s4 = sshll.u32 %s124_s30, 7 }
  0x17   : > { %s133_s7 = scalar_lea.hbm %s1335_s0, %s771_s3  ;;  %s128_s14 = scalar_lea.vmem [#allocation2], %s750_s4 }
  0x18   : > { %s134_s8 = sshll.u32 %s133_s7, 4  ;;  %s136_s17 = sshll.u32 %s128_s14, 4  ;;  %s135_s8 = int_to_ptr.hbm [resolvable:$true] %s134_s8  ;;  %s137_s17 = int_to_ptr.vmem [resolvable:$true] %s136_s17 }
  0x19   : > { %p1122_p9 = pnand %p794_p3, %p35_p5  ;;  %s125_s19 = scalar_lea.sflag [#allocation3], %s124_s30 }
  0x1a   : > { %s917_s21 = sshra.s32 %s135_s8, 4  ;;  %s924_s26 = scalar_lea.hbm %s1335_s0, 256  ;;  %s918_s21 = int_to_ptr.hbm [resolvable:$true] %s917_s21 }
  0x1b   : > { %s919_s22 = scalar_lea.hbm %s918_s21, 128  ;;  %p921_p10 = pneg %p1122_p9 }
  0x1c   : > { %p920_p2 = scmp.ne.s32.totalorder %s918_s21, %s919_s22  ;;  %p925_p0 = scmp.lt.s32.totalorder %s918_s21, %s1335_s0 }
  0x1d   : > { %p926_p3 = scmp.lt.s32.totalorder %s924_s26, %s919_s22 }
  0x1e   : > { %p922_p12 = pnand %p921_p10, %p920_p2 }
  0x1f   : > { %p927_p5 = por %p926_p3, %p925_p0 }
  0x20   : > { %p923_p13 = pneg %p922_p12 }
  0x22   : > { %p928_p11 = pnand %p927_p5, %p923_p13 }
  0x24   : > { %931 = shalt.err (!%p928_p11)
}
  0x25   : > { %s1022_s30 = smov 256   ;;  %s1023_s4 = smov 16  }
  0x26   : > { %788 = dma.hbm_to_vmem [thread:$0]  (!%p1122_p9), %s135_s8, 2048, %s137_s17, %s125_s19, %s1022_s30, %s1022_s30, %s1023_s4  }
  0x27   : > { %148 = sbr.rel (%p1087_p8) target bundleno = 567 (0x237), region = 28  ;;  %s1139_s5 = sand.u32 (!%p1087_p8), 1, %s1009_s10  }
  0x28   : > { %s754_s6 = sshll.u32 (!%p1087_p8), %s1139_s5, 7  ;;  %s151_s7 = scalar_lea.sflag (!%p1087_p8), [#allocation3], %s1139_s5 }
  0x29   : > { %s1145_s14 = scalar_lea.vmem (!%p1087_p8), [#allocation2], %s754_s6 }
  0x2c   : > { %992 = dma.done.wait (%p1074_p4), %s151_s7, 2048  }
  0x2d   : > { %994 = vsyncadd (%p1074_p4), %s151_s7, 4294965248 }
  0x2e   : > { %996 = dma.done.wait (%p40_p1), [#allocation6], 1152  }
  0x2f   : > { %998 = vsyncadd (%p40_p1), [#allocation6], 4294966144  ;;  %v1156_v0 = vld [vmem:[%s1145_s14] sm:$0xff]  ;;  %v1159_v1 = vld [vmem:[%s1145_s14 + $0x8] sm:$0xff]  ;;  %s1024_s15 = smov 64   ;;  %s1025_s20 = smov 124   ;;  %v359_v33 = vlaneseq }
  0x30   : > { %v1162_v2 = vld [vmem:[%s1145_s14 + $0x20] sm:$0xff]  ;;  %v197_v3 = vadd.f32 %v1159_v1, %v1156_v0  ;;  %v1167_v4 = vld [vmem:[%s1145_s14 + $0x28] sm:$0xff]  ;;  %v1180_v9 = vld [vmem:[%s1145_s14 + $0x10] sm:$0xff]  ;;  %vm246_vm0 = vcmask 31744   ;;  %s1271_s8 = scalar_lea.vmem [#allocation7], %s754_s6  ;;  %s772_s17 = sshll.u32 %s1065_s13, 7 }
  0x31   : > { %v1170_v5 = vld [vmem:[%s1145_s14 + $0x40] sm:$0xff]  ;;  %v1173_v6 = vld [vmem:[%s1145_s14 + $0x48] sm:$0xff]  ;;  %v203_v7 = vadd.f32 %v1167_v4, %v1162_v2  ;;  %v1183_v10 = vld [vmem:[%s1145_s14 + $0x18] sm:$0xff]  ;;  %v1219_v34 = vshrl.u32 %v359_v33, 7  ;;  %s659_s21 = scalar_lea.hbm %s1337_s2, %s772_s17  ;;  %s660_s22 = sshll.u32 %s1271_s8, 4  ;;  %s661_s22 = int_to_ptr.vmem [resolvable:$true] %s660_s22 }
  0x32   : > { %v209_v8 = vadd.f32 %v1173_v6, %v1170_v5  ;;  %198 = vadd.xlane.f32.xlu0 %v197_v3  ;;  %v1186_v11 = vld [vmem:[%s1145_s14 + $0x30] sm:$0xff]  ;;  %v1189_v12 = vld [vmem:[%s1145_s14 + $0x38] sm:$0xff]  ;;  %v200_v15 = vadd.f32 %v1183_v10, %v1180_v9  ;;  %v1204_v18 = vld [vmem:[%s1145_s14 + $0x60] sm:$0xff]  ;;  %s662_s24 = sshll.u32 %s659_s21, 4  ;;  %s648_s25 = scalar_lea.sflag [#allocation4], %s1139_s5  ;;  %s663_s24 = int_to_ptr.hbm [resolvable:$true] %s662_s24 }
  0x33   : > { %204 = vadd.xlane.f32.xlu1 %v203_v7  ;;  %v1192_v13 = vld [vmem:[%s1145_s14 + $0x50] sm:$0xff]  ;;  %v1195_v14 = vld [vmem:[%s1145_s14 + $0x58] sm:$0xff]  ;;  %v206_v16 = vadd.f32 %v1189_v12, %v1186_v11  ;;  %v1207_v19 = vld [vmem:[%s1145_s14 + $0x68] sm:$0xff]  ;;  %v367_v35 = vadd.s32 8, %v1219_v34  ;;  %839 = vset.pattern.permute.xlu2 %v1219_v34  ;;  %s961_s26 = sshra.s32 %s663_s24, 4  ;;  %s967_s30 = scalar_lea.hbm %s1337_s2, 256  ;;  %s962_s26 = int_to_ptr.hbm [resolvable:$true] %s961_s26 }
  0x34   : > { %210 = vadd.xlane.f32.xlu2 %v209_v8  ;;  %v212_v17 = vadd.f32 %v1195_v14, %v1192_v13  ;;  %v1210_v20 = vld [vmem:[%s1145_s14 + $0x70] sm:$0xff]  ;;  %v1213_v21 = vld [vmem:[%s1145_s14 + $0x78] sm:$0xff]  ;;  %v215_v22 = vadd.f32 %v1207_v19, %v1204_v18  ;;  %v237_v24 = vld [vmem:[#allocation5 + $0x40] sm:$0x1]  ;;  %s963_s13 = scalar_lea.hbm %s962_s26, 128  ;;  %p968_p11 = scmp.lt.s32.totalorder %s962_s26, %s1337_s2 }
  0x35   : > { %v218_v23 = vadd.f32 %v1213_v21, %v1210_v20  ;;  %v229_v25 = vld [vmem:[#allocation5] sm:$0xff]  ;;  %v231_v26 = vld [vmem:[#allocation5 + $0x10] sm:$0xff]  ;;  %v230_v27 = vld [vmem:[#allocation5 + $0x8] sm:$0xff]  ;;  %840 = vset.pattern.permute.xlu1 %v367_v35  ;;  %p964_p1 = scmp.ne.s32.totalorder %s962_s26, %s963_s13  ;;  %p969_p9 = scmp.lt.s32.totalorder %s967_s30, %s963_s13 }
  0x36   : > { %v232_v28 = vld [vmem:[#allocation5 + $0x18] sm:$0xff]  ;;  %v233_v29 = vld [vmem:[#allocation5 + $0x20] sm:$0xff]  ;;  %v234_v30 = vld [vmem:[#allocation5 + $0x28] sm:$0xff] }
  0x37   : > { %v235_v31 = vld [vmem:[#allocation5 + $0x30] sm:$0xff]  ;;  %v236_v32 = vld [vmem:[#allocation5 + $0x38] sm:$0xff]  ;;  %v1223_v36 = vld [vmem:[#allocation5 + $0x40] ss:$0 sm:$0xff]  ;;  %p965_p4 = pnand %p964_p1, %p1111_p7  ;;  %p970_p2 = por %p969_p9, %p968_p11 }
  0x39   : > { %p966_p8 = pneg %p965_p4 }
  0x3a   : > { %201 = vadd.xlane.f32.xlu0 %v200_v15 }
  0x3b   : > { %207 = vadd.xlane.f32.xlu1 %v206_v16  ;;  %p971_p10 = pnand %p970_p2, %p966_p8 }
  0x3c   : > { %213 = vadd.xlane.f32.xlu2 %v212_v17 }
  0x42   : > { %216 = vadd.xlane.f32.xlu0 %v215_v22 }
  0x43   : > { %219 = vadd.xlane.f32.xlu1 %v218_v23 }
  0x54   : > { %269 = vrot.lane.b32.xlu2 %v237_v24, %s1024_s15 }
  0x56   : > { %302 = vrot.lane.b32.xlu0 %v229_v25, %s1025_s20 }
  0x5c   : > { %306 = vrot.lane.b32.xlu2 %v231_v26, %s1025_s20  ;;  %304 = vrot.lane.b32.xlu1 %v230_v27, %s1025_s20 }
  0x5e   : > { %308 = vrot.lane.b32.xlu0 %v232_v28, %s1025_s20 }
  0x64   : > { %310 = vrot.lane.b32.xlu2 %v233_v29, %s1025_s20  ;;  %312 = vrot.lane.b32.xlu1 %v234_v30, %s1025_s20 }
  0x66   : > { %314 = vrot.lane.b32.xlu0 %v235_v31, %s1025_s20 }
  0x6c   : > { %316 = vrot.lane.b32.xlu2 %v236_v32, %s1025_s20  ;;  %369 = vperm.xlu1 %840, %v1223_v36  }
  0x74   : > { %363 = vperm.xlu2 %839, %v1223_v36  }
  0xa5   : > { %v199_v37 = vpop.xlane.xlu0 %198 }
  0xa6   : > { %v205_v38 = vpop.xlane.xlu1 %204  ;;  %v221_v40 = vmul.f32 0.00390625, %v199_v37 }
  0xa7   : > { %v211_v39 = vpop.xlane.xlu2 %210  ;;  %v223_v41 = vmul.f32 0.00390625, %v205_v38 }
  0xa8   : > { %v238_v43 = vmul.f32 %v229_v25, %v221_v40  ;;  %v225_v49 = vmul.f32 0.00390625, %v211_v39 }
  0xa9   : > { %v240_v48 = vmul.f32 %v231_v26, %v223_v41 }
  0xaa   : > { %v247_v53 = vsel %vm246_vm0, %v238_v43, 0.0  ;;  %v242_v57 = vmul.f32 %v233_v29, %v225_v49 }
  0xab   : > { %v250_v56 = vsel %vm246_vm0, %v240_v48, 0.0 }
  0xac   : > { %v254_v8 = vsel %vm246_vm0, %v242_v57, 0.0 }
  0xad   : > { %v202_v42 = vpop.xlane.xlu0 %201 }
  0xae   : > { %v222_v44 = vmul.f32 0.00390625, %v202_v42  ;;  %v208_v45 = vpop.xlane.xlu1 %207 }
  0xaf   : > { %v214_v46 = vpop.xlane.xlu2 %213  ;;  %v224_v47 = vmul.f32 0.00390625, %v208_v45  ;;  %v373_v45 = vadd.s32 16, %v1219_v34 }
  0xb0   : > { %v239_v50 = vmul.f32 %v230_v27, %v222_v44  ;;  %v226_v51 = vmul.f32 0.00390625, %v214_v46  ;;  %v379_v44 = vadd.s32 24, %v1219_v34 }
  0xb1   : > { %v241_v52 = vmul.f32 %v232_v28, %v224_v47  ;;  %841 = vset.pattern.permute.xlu0 %v373_v45 }
  0xb2   : > { %v248_v54 = vsel %vm246_vm0, %v239_v50, 0.0  ;;  %v243_v59 = vmul.f32 %v234_v30, %v226_v51  ;;  %842 = vset.pattern.permute.xlu2 %v379_v44 }
  0xb3   : > { %v249_v55 = vadd.f32 %v248_v54, %v247_v53  ;;  %v252_v58 = vsel %vm246_vm0, %v241_v52, 0.0 }
  0xb4   : > { %v256_v15 = vsel %vm246_vm0, %v243_v59, 0.0 }
  0xb5   : > { %v251_v60 = vadd.f32 %v250_v56, %v249_v55  ;;  %v217_v61 = vpop.xlane.xlu0 %216 }
  0xb6   : > { %v227_v62 = vmul.f32 0.00390625, %v217_v61  ;;  %v220_v63 = vpop.xlane.xlu1 %219 }
  0xb7   : > { %v253_v3 = vadd.f32 %v252_v58, %v251_v60  ;;  %v228_v7 = vmul.f32 0.00390625, %v220_v63  ;;  %v270_v37 = vpop.permute.xlu2 %269 }
  0xb8   : > { %v244_v16 = vmul.f32 %v235_v31, %v227_v62 }
  0xb9   : > { %v255_v17 = vadd.f32 %v254_v8, %v253_v3  ;;  %v245_v22 = vmul.f32 %v236_v32, %v228_v7 }
  0xba   : > { %v258_v23 = vsel %vm246_vm0, %v244_v16, 0.0 }
  0xbb   : > { %v257_v24 = vadd.f32 %v256_v15, %v255_v17  ;;  %v260_v25 = vsel %vm246_vm0, %v245_v22, 0.0  ;;  %v385_v15 = vadd.s32 32, %v1219_v34 }
  0xbd   : > { %v259_v26 = vadd.f32 %v258_v23, %v257_v24  ;;  %843 = vset.pattern.permute.xlu1 %v385_v15 }
  0xbf   : > { %v261_v27 = vadd.f32 %v260_v25, %v259_v26  ;;  %v307_v49 = vpop.permute.xlu2 %306 }
  0xc1   : > { %v262_v28 = vrot.slane %v261_v27, 4 }
  0xc3   : > { %v263_v29 = vadd.f32 %v262_v28, %v261_v27 }
  0xc5   : > { %v264_v30 = vrot.slane %v263_v29, 2 }
  0xc7   : > { %v265_v33 = vadd.f32 %v264_v30, %v263_v29  ;;  %v311_v61 = vpop.permute.xlu2 %310 }
  0xc8   : > { %v303_v51 = vpop.permute.xlu0 %302 }
  0xc9   : > { %v266_v35 = vrot.slane %v265_v33, 1 }
  0xcb   : > { %v267_v38 = vadd.f32 %v266_v35, %v265_v33  ;;  %v391_v35 = vadd.s32 40, %v1219_v34 }
  0xcd   : > { %v272_v39 = vadd.f32 %v270_v37, %v267_v38  ;;  %v397_v37 = vadd.s32 48, %v1219_v34  ;;  %v403_v38 = vadd.s32 56, %v1219_v34 }
  0xce   : > { %v305_v53 = vpop.permute.xlu1 %304 }
  0xcf   : > { %v757_v40 = vmul.f32 -1.442695, %v272_v39  ;;  %v317_v25 = vpop.permute.xlu2 %316 }
  0xd0   : > { %v309_v62 = vpop.permute.xlu0 %308 }
  0xd1   : > { %851 = vpow2.f32 %v757_v40 }
  0xd6   : > { %v313_v8 = vpop.permute.xlu1 %312 }
  0xd7   : > { %v852_v31 = vpop.eup %851 }
  0xd8   : > { %v276_v41 = vadd.f32 1.0, %v852_v31  ;;  %v315_v27 = vpop.permute.xlu0 %314  ;;  %v1026_v31 = vmov 0  }
  0xda   : > { %853 = vrcp.f32 %v276_v41  ;;  %v288_v46 = vand.u32 2147483648, %v276_v41  ;;  %v286_v48 = vand.u32 2147483647, %v276_v41  ;;  %vm282_vm2 = vweird.f32 %v276_v41 }
  0xdc   : > { %v289_v52 = vor.u32 1.1754944e-38, %v288_v46  ;;  %vm287_vm4 = vcmp.eq.f32.partialorder %v286_v48, 8.507059e+37 }
  0xde   : > { %v370_v40 = vpop.permute.xlu1 %369 }
  0xe0   : > { %v854_v32 = vpop.eup %853 }
  0xe1   : > { %v278_v42 = vmul.f32 %v854_v32, %v276_v41  ;;  %vm283_vm1 = vweird.f32 %v854_v32 }
  0xe2   : > { %vm284_vm3 = vmor %vm282_vm2, %vm283_vm1 }
  0xe3   : > { %v279_v43 = vsub.f32 1.0, %v278_v42 }
  0xe5   : > { %v280_v47 = vmul.f32 %v854_v32, %v279_v43 }
  0xe7   : > { %v281_v50 = vadd.f32 %v854_v32, %v280_v47 }
  0xe9   : > { %v285_v54 = vsel %vm284_vm3, %v854_v32, %v281_v50 }
  0xea   : > { %v290_v55 = vsel %vm287_vm4, %v289_v52, %v285_v54 }
  0xeb   : > { %v292_v56 = vmul.f32 %v290_v55, %v272_v39  ;;  %v364_v39 = vpop.permute.xlu2 %363 }
  0xed   : > { %v293_v57 = vperm.slane %v292_v56, 0 }
  0xef   : > { %v328_v58 = vmul.f32 %v307_v49, %v293_v57  ;;  %v326_v59 = vmul.f32 %v303_v51, %v293_v57  ;;  %v327_v60 = vmul.f32 %v305_v53, %v293_v57  ;;  %v330_v16 = vmul.f32 %v311_v61, %v293_v57 }
  0xf0   : > { %v331_v17 = vmul.f32 %v313_v8, %v293_v57  ;;  %v329_v22 = vmul.f32 %v309_v62, %v293_v57  ;;  %v333_v28 = vmul.f32 %v317_v25, %v293_v57  ;;  %v332_v29 = vmul.f32 %v315_v27, %v293_v57 }
  0xf1   : > { %v340_v63 = vsel %vm246_vm0, %v328_v58, 0.0  ;;  %v337_v3 = vsel %vm246_vm0, %v327_v60, 0.0  ;;  %v334_v7 = vsel %vm246_vm0, %v326_v59, 0.0  ;;  %v346_v24 = vsel %vm246_vm0, %v330_v16, 0.0 }
  0xf2   : > { %341 = vadd.xlane.f32.xlu2 %v340_v63  ;;  %338 = vadd.xlane.f32.xlu0 %v337_v3  ;;  %v349_v23 = vsel %vm246_vm0, %v331_v17, 0.0  ;;  %v343_v26 = vsel %vm246_vm0, %v329_v22, 0.0  ;;  %v355_v30 = vsel %vm246_vm0, %v333_v28, 0.0  ;;  %v352_v33 = vsel %vm246_vm0, %v332_v29, 0.0 }
  0xf3   : > { %335 = vadd.xlane.f32.xlu1 %v334_v7 }
  0xfa   : > { %350 = vadd.xlane.f32.xlu2 %v349_v23  ;;  %347 = vadd.xlane.f32.xlu0 %v346_v24 }
  0xfb   : > { %344 = vadd.xlane.f32.xlu1 %v343_v26 }
 0x102   : > { %356 = vadd.xlane.f32.xlu0 %v355_v30 }
 0x103   : > { %353 = vadd.xlane.f32.xlu1 %v352_v33 }
 0x112   : > { %381 = vperm.xlu2 %842, %v1223_v36  }
 0x116   : > { %375 = vperm.xlu0 %841, %v1223_v36  }
 0x11a   : > { %844 = vset.pattern.permute.xlu2 %v391_v35 }
 0x11c   : > { %387 = vperm.xlu1 %843, %v1223_v36  }
 0x11e   : > { %848 = vset.pattern.permute.xlu0 %v1026_v31 }
 0x122   : > { %393 = vperm.xlu2 %844, %v1223_v36  }
 0x124   : > { %845 = vset.pattern.permute.xlu1 %v397_v37 }
 0x12a   : > { %846 = vset.pattern.permute.xlu2 %v403_v38 }
 0x12c   : > { %399 = vperm.xlu1 %845, %v1223_v36  }
 0x132   : > { %405 = vperm.xlu2 %846, %v1223_v36  }
 0x134   : > { %847 = vset.pattern.permute.xlu1 %v1026_v31 }
 0x13a   : > { %849 = vset.pattern.permute.xlu2 %v1026_v31 }
 0x165   : > { %v1255_v41 = vpop.xlane.xlu2 %341  ;;  %v339_v32 = vpop.xlane.xlu0 %338 }
 0x166   : > { %v336_v42 = vpop.xlane.xlu1 %335  ;;  %v416_v43 = vadd.f32 %v370_v40, %v339_v32 }
 0x167   : > { %v415_v44 = vadd.f32 %v364_v39, %v336_v42 }
 0x168   : > { %v759_v45 = vmul.f32 -1.442695, %v416_v43 }
 0x169   : > { %v758_v46 = vmul.f32 -1.442695, %v415_v44 }
 0x16a   : > { %855 = vpow2.f32 %v759_v45 }
 0x16b   : > { %857 = vpow2.f32 %v758_v46 }
 0x16d   : > { %v351_v34 = vpop.xlane.xlu2 %350  ;;  %v348_v52 = vpop.xlane.xlu0 %347 }
 0x16e   : > { %v345_v50 = vpop.xlane.xlu1 %344 }
 0x170   : > { %v856_v47 = vpop.eup %855 }
 0x171   : > { %v858_v48 = vpop.eup %857  ;;  %v448_v36 = vadd.f32 1.0, %v856_v47 }
 0x172   : > { %v447_v49 = vadd.f32 1.0, %v858_v48 }
 0x173   : > { %859 = vrcp.f32 %v448_v36  ;;  %v479_v62 = vand.u32 2147483647, %v448_v36  ;;  %v481_v63 = vand.u32 2147483648, %v448_v36  ;;  %vm475_vm7 = vweird.f32 %v448_v36 }
 0x174   : > { %861 = vrcp.f32 %v447_v49  ;;  %v466_v7 = vand.u32 2147483648, %v447_v49  ;;  %v464_v16 = vand.u32 2147483647, %v447_v49  ;;  %vm460_vm8 = vweird.f32 %v447_v49 }
 0x175   : > { %v382_v51 = vpop.permute.xlu2 %381  ;;  %v357_v22 = vpop.xlane.xlu0 %356  ;;  %v482_v27 = vor.u32 1.1754944e-38, %v481_v63  ;;  %vm480_vm11 = vcmp.eq.f32.partialorder %v479_v62, 8.507059e+37 }
 0x176   : > { %v418_v53 = vadd.f32 %v382_v51, %v345_v50  ;;  %v467_v28 = vor.u32 1.1754944e-38, %v466_v7  ;;  %vm465_vm12 = vcmp.eq.f32.partialorder %v464_v16, 8.507059e+37  ;;  %v354_v37 = vpop.xlane.xlu1 %353 }
 0x178   : > { %v761_v54 = vmul.f32 -1.442695, %v418_v53 }
 0x179   : > { %v860_v55 = vpop.eup %859 }
 0x17a   : > { %v862_v56 = vpop.eup %861  ;;  %863 = vpow2.f32 %v761_v54  ;;  %v471_v57 = vmul.f32 %v860_v55, %v448_v36  ;;  %vm476_vm5 = vweird.f32 %v860_v55 }
 0x17b   : > { %v456_v58 = vmul.f32 %v862_v56, %v447_v49  ;;  %vm461_vm6 = vweird.f32 %v862_v56  ;;  %vm477_vm9 = vmor %vm475_vm7, %vm476_vm5 }
 0x17c   : > { %v472_v59 = vsub.f32 1.0, %v471_v57  ;;  %vm462_vm10 = vmor %vm460_vm8, %vm461_vm6 }
 0x17d   : > { %v394_v60 = vpop.permute.xlu2 %393  ;;  %v457_v61 = vsub.f32 1.0, %v456_v58 }
 0x17e   : > { %v420_v3 = vadd.f32 %v394_v60, %v351_v34  ;;  %v473_v8 = vmul.f32 %v860_v55, %v472_v59 }
 0x17f   : > { %v458_v15 = vmul.f32 %v862_v56, %v457_v61 }
 0x180   : > { %v864_v17 = vpop.eup %863  ;;  %v763_v23 = vmul.f32 -1.442695, %v420_v3  ;;  %v474_v24 = vadd.f32 %v860_v55, %v473_v8 }
 0x181   : > { %v450_v25 = vadd.f32 1.0, %v864_v17  ;;  %v459_v26 = vadd.f32 %v862_v56, %v458_v15 }
 0x182   : > { %865 = vpow2.f32 %v763_v23  ;;  %v478_v29 = vsel %vm477_vm9, %v860_v55, %v474_v24 }
 0x183   : > { %867 = vrcp.f32 %v450_v25  ;;  %v463_v30 = vsel %vm462_vm10, %v862_v56, %v459_v26  ;;  %v483_v33 = vsel %vm480_vm11, %v482_v27, %v478_v29  ;;  %v511_v34 = vand.u32 2147483648, %v450_v25 }
 0x184   : > { %v468_v35 = vsel %vm465_vm12, %v467_v28, %v463_v30  ;;  %582 = vperm.xlu0 %848, %v483_v33   ;;  %v509_v36 = vand.u32 2147483647, %v450_v25  ;;  %vm505_vm14 = vweird.f32 %v450_v25 }
 0x185   : > { %577 = vperm.xlu1 %847, %v468_v35  }
 0x186   : > { %vm510_vm0 = vcmp.eq.f32.partialorder %v509_v36, 8.507059e+37 }
 0x188   : > { %v866_v38 = vpop.eup %865  ;;  %v376_v39 = vpop.permute.xlu0 %375 }
 0x189   : > { %v868_v40 = vpop.eup %867  ;;  %v452_v31 = vadd.f32 1.0, %v866_v38  ;;  %v417_v32 = vadd.f32 %v376_v39, %v1255_v41  ;;  %v512_v41 = vor.u32 1.1754944e-38, %v511_v34 }
 0x18a   : > { %v501_v42 = vmul.f32 %v868_v40, %v450_v25  ;;  %vm506_vm13 = vweird.f32 %v868_v40 }
 0x18b   : > { %869 = vrcp.f32 %v452_v31  ;;  %v760_v43 = vmul.f32 -1.442695, %v417_v32  ;;  %vm507_vm15 = vmor %vm505_vm14, %vm506_vm13  ;;  %v541_v61 = vand.u32 2147483648, %v452_v31  ;;  %vm535_vm2 = vweird.f32 %v452_v31 }
 0x18c   : > { %v406_v44 = vpop.permute.xlu2 %405  ;;  %v502_v45 = vsub.f32 1.0, %v501_v42 }
 0x18d   : > { %871 = vpow2.f32 %v760_v43  ;;  %v422_v46 = vadd.f32 %v406_v44, %v357_v22  ;;  %v542_v15 = vor.u32 1.1754944e-38, %v541_v61 }
 0x18e   : > { %v388_v47 = vpop.permute.xlu1 %387  ;;  %v503_v48 = vmul.f32 %v868_v40, %v502_v45 }
 0x18f   : > { %v765_v49 = vmul.f32 -1.442695, %v422_v46  ;;  %v419_v50 = vadd.f32 %v388_v47, %v348_v52  ;;  %v539_v52 = vand.u32 2147483647, %v452_v31 }
 0x190   : > { %v504_v51 = vadd.f32 %v868_v40, %v503_v48 }
 0x191   : > { %v870_v53 = vpop.eup %869  ;;  %873 = vpow2.f32 %v765_v49  ;;  %v762_v54 = vmul.f32 -1.442695, %v419_v50  ;;  %vm540_vm4 = vcmp.eq.f32.partialorder %v539_v52, 8.507059e+37 }
 0x192   : > { %v508_v55 = vsel %vm507_vm15, %v868_v40, %v504_v51  ;;  %v531_v56 = vmul.f32 %v870_v53, %v452_v31  ;;  %vm536_vm1 = vweird.f32 %v870_v53 }
 0x193   : > { %v872_v57 = vpop.eup %871  ;;  %875 = vpow2.f32 %v762_v54  ;;  %v513_v58 = vsel %vm510_vm0, %v512_v41, %v508_v55  ;;  %vm537_vm3 = vmor %vm535_vm2, %vm536_vm1 }
 0x194   : > { %v449_v59 = vadd.f32 1.0, %v872_v57  ;;  %592 = vperm.xlu1 %847, %v513_v58   ;;  %v532_v60 = vsub.f32 1.0, %v531_v56 }
 0x196   : > { %877 = vrcp.f32 %v449_v59  ;;  %v533_v62 = vmul.f32 %v870_v53, %v532_v60  ;;  %v496_v29 = vand.u32 2147483648, %v449_v59  ;;  %v494_v35 = vand.u32 2147483647, %v449_v59 }
 0x197   : > { %v874_v63 = vpop.eup %873  ;;  %vm490_vm6 = vweird.f32 %v449_v59 }
 0x198   : > { %v1258_v3 = vadd.f32 1.0, %v874_v63  ;;  %v534_v7 = vadd.f32 %v870_v53, %v533_v62  ;;  %v497_v32 = vor.u32 1.1754944e-38, %v496_v29  ;;  %vm495_vm8 = vcmp.eq.f32.partialorder %v494_v35, 8.507059e+37 }
 0x199   : > { %v876_v8 = vpop.eup %875 }
 0x19a   : > { %879 = vrcp.f32 %v1258_v3  ;;  %v451_v16 = vadd.f32 1.0, %v876_v8  ;;  %v538_v17 = vsel %vm537_vm3, %v870_v53, %v534_v7  ;;  %v571_v41 = vand.u32 2147483648, %v1258_v3 }
 0x19b   : > { %v543_v22 = vsel %vm540_vm4, %v542_v15, %v538_v17  ;;  %vm565_vm14 = vweird.f32 %v1258_v3  ;;  %v569_v55 = vand.u32 2147483647, %v1258_v3 }
 0x19c   : > { %v878_v23 = vpop.eup %877  ;;  %881 = vrcp.f32 %v451_v16  ;;  %602 = vperm.xlu1 %847, %v543_v22   ;;  %v526_v46 = vand.u32 2147483648, %v451_v16  ;;  %vm520_vm10 = vweird.f32 %v451_v16  ;;  %v524_v48 = vand.u32 2147483647, %v451_v16 }
 0x19d   : > { %v486_v24 = vmul.f32 %v878_v23, %v449_v59  ;;  %vm491_vm5 = vweird.f32 %v878_v23  ;;  %v572_v59 = vor.u32 1.1754944e-38, %v571_v41  ;;  %vm570_vm0 = vcmp.eq.f32.partialorder %v569_v55, 8.507059e+37 }
 0x19e   : > { %v400_v25 = vpop.permute.xlu1 %399  ;;  %vm492_vm7 = vmor %vm490_vm6, %vm491_vm5  ;;  %v527_v51 = vor.u32 1.1754944e-38, %v526_v46  ;;  %vm525_vm12 = vcmp.eq.f32.partialorder %v524_v48, 8.507059e+37 }
 0x19f   : > { %v421_v26 = vadd.f32 %v400_v25, %v354_v37  ;;  %v487_v27 = vsub.f32 1.0, %v486_v24 }
 0x1a0   : > { %v880_v28 = vpop.eup %879 }
 0x1a1   : > { %v764_v30 = vmul.f32 -1.442695, %v421_v26  ;;  %v488_v33 = vmul.f32 %v878_v23, %v487_v27  ;;  %v561_v31 = vmul.f32 %v880_v28, %v1258_v3  ;;  %vm566_vm13 = vweird.f32 %v880_v28 }
 0x1a2   : > { %v882_v38 = vpop.eup %881  ;;  %vm567_vm15 = vmor %vm565_vm14, %vm566_vm13 }
 0x1a3   : > { %883 = vpow2.f32 %v764_v30  ;;  %v489_v39 = vadd.f32 %v878_v23, %v488_v33  ;;  %v516_v40 = vmul.f32 %v882_v38, %v451_v16  ;;  %vm521_vm9 = vweird.f32 %v882_v38 }
 0x1a4   : > { %v562_v45 = vsub.f32 1.0, %v561_v31  ;;  %vm522_vm11 = vmor %vm520_vm10, %vm521_vm9 }
 0x1a5   : > { %v493_v42 = vsel %vm492_vm7, %v878_v23, %v489_v39  ;;  %v517_v43 = vsub.f32 1.0, %v516_v40 }
 0x1a6   : > { %v498_v37 = vsel %vm495_vm8, %v497_v32, %v493_v42  ;;  %v563_v50 = vmul.f32 %v880_v28, %v562_v45 }
 0x1a7   : > { %587 = vperm.xlu2 %849, %v498_v37   ;;  %v518_v44 = vmul.f32 %v882_v38, %v517_v43 }
 0x1a8   : > { %v564_v54 = vadd.f32 %v880_v28, %v563_v50 }
 0x1a9   : > { %v884_v34 = vpop.eup %883  ;;  %v519_v47 = vadd.f32 %v882_v38, %v518_v44 }
 0x1aa   : > { %v453_v36 = vadd.f32 1.0, %v884_v34  ;;  %v568_v57 = vsel %vm567_vm15, %v880_v28, %v564_v54 }
 0x1ab   : > { %v523_v49 = vsel %vm522_vm11, %v882_v38, %v519_v47  ;;  %v573_v61 = vsel %vm570_vm0, %v572_v59, %v568_v57 }
 0x1ac   : > { %885 = vrcp.f32 %v453_v36  ;;  %v528_v53 = vsel %vm525_vm12, %v527_v51, %v523_v49  ;;  %v556_v62 = vand.u32 2147483648, %v453_v36  ;;  %v554_v63 = vand.u32 2147483647, %v453_v36 }
 0x1ad   : > { %vm550_vm2 = vweird.f32 %v453_v36 }
 0x1ae   : > { %v557_v8 = vor.u32 1.1754944e-38, %v556_v62  ;;  %vm555_vm4 = vcmp.eq.f32.partialorder %v554_v63, 8.507059e+37 }
 0x1af   : > { %597 = vperm.xlu2 %849, %v528_v53  }
 0x1b2   : > { %v886_v56 = vpop.eup %885 }
 0x1b3   : > { %v546_v58 = vmul.f32 %v886_v56, %v453_v36  ;;  %vm551_vm1 = vweird.f32 %v886_v56 }
 0x1b4   : > { %vm552_vm3 = vmor %vm550_vm2, %vm551_vm1 }
 0x1b5   : > { %v547_v60 = vsub.f32 1.0, %v546_v58 }
 0x1b7   : > { %612 = vperm.xlu2 %849, %v573_v61   ;;  %v548_v52 = vmul.f32 %v886_v56, %v547_v60 }
 0x1b9   : > { %v549_v7 = vadd.f32 %v886_v56, %v548_v52 }
 0x1bb   : > { %v553_v15 = vsel %vm552_vm3, %v886_v56, %v549_v7 }
 0x1bc   : > { %v558_v3 = vsel %vm555_vm4, %v557_v8, %v553_v15 }
 0x1bd   : > { %607 = vperm.xlu0 %848, %v558_v3  }
 0x1f6   : > { %v583_v16 = vpop.permute.xlu0 %582 }
 0x1f7   : > { %v578_v17 = vpop.permute.xlu1 %577  ;;  %v617_v22 = vmul.f32 %v583_v16, %v1180_v9  ;;  %v618_v25 = vmul.f32 %v583_v16, %v1183_v10 }
 0x1f8   : > { %v615_v23 = vmul.f32 %v578_v17, %v1156_v0  ;;  %v616_v24 = vmul.f32 %v578_v17, %v1159_v1 }
 0x1f9   : > { %633 = vst [vmem:[%s1271_s8 + $0x10] sm:$0xff] %v617_v22 }
 0x1fa   : > { %631 = vst [vmem:[%s1271_s8] sm:$0xff] %v615_v23 }
 0x1fb   : > { %632 = vst [vmem:[%s1271_s8 + $0x8] sm:$0xff] %v616_v24 }
 0x1fc   : > { %634 = vst [vmem:[%s1271_s8 + $0x18] sm:$0xff] %v618_v25 }
 0x201   : > { %v588_v0 = vpop.permute.xlu2 %587 }
 0x202   : > { %v619_v1 = vmul.f32 %v588_v0, %v1162_v2  ;;  %v620_v9 = vmul.f32 %v588_v0, %v1167_v4 }
 0x204   : > { %635 = vst [vmem:[%s1271_s8 + $0x20] sm:$0xff] %v619_v1 }
 0x205   : > { %636 = vst [vmem:[%s1271_s8 + $0x28] sm:$0xff] %v620_v9 }
 0x206   : > { %v593_v10 = vpop.permute.xlu1 %592 }
 0x207   : > { %v621_v26 = vmul.f32 %v593_v10, %v1186_v11  ;;  %v622_v27 = vmul.f32 %v593_v10, %v1189_v12 }
 0x209   : > { %637 = vst [vmem:[%s1271_s8 + $0x30] sm:$0xff] %v621_v26  ;;  %v598_v28 = vpop.permute.xlu2 %597 }
 0x20a   : > { %638 = vst [vmem:[%s1271_s8 + $0x38] sm:$0xff] %v622_v27  ;;  %v623_v29 = vmul.f32 %v598_v28, %v1170_v5  ;;  %v624_v2 = vmul.f32 %v598_v28, %v1173_v6 }
 0x20c   : > { %639 = vst [vmem:[%s1271_s8 + $0x40] sm:$0xff] %v623_v29 }
 0x20d   : > { %640 = vst [vmem:[%s1271_s8 + $0x48] sm:$0xff] %v624_v2 }
 0x20e   : > { %v603_v4 = vpop.permute.xlu1 %602 }
 0x20f   : > { %v625_v30 = vmul.f32 %v603_v4, %v1192_v13  ;;  %v626_v11 = vmul.f32 %v603_v4, %v1195_v14 }
 0x211   : > { %641 = vst [vmem:[%s1271_s8 + $0x50] sm:$0xff] %v625_v30  ;;  %v613_v12 = vpop.permute.xlu2 %612 }
 0x212   : > { %642 = vst [vmem:[%s1271_s8 + $0x58] sm:$0xff] %v626_v11  ;;  %v629_v33 = vmul.f32 %v613_v12, %v1210_v20  ;;  %v630_v5 = vmul.f32 %v613_v12, %v1213_v21 }
 0x214   : > { %645 = vst [vmem:[%s1271_s8 + $0x70] sm:$0xff] %v629_v33 }
 0x215   : > { %646 = vst [vmem:[%s1271_s8 + $0x78] sm:$0xff] %v630_v5 }
 0x22f   : > { %v608_v6 = vpop.permute.xlu0 %607 }
 0x230   : > { %v627_v13 = vmul.f32 %v608_v6, %v1204_v18  ;;  %v628_v14 = vmul.f32 %v608_v6, %v1207_v19 }
 0x232   : > { %643 = vst [vmem:[%s1271_s8 + $0x60] sm:$0xff] %v627_v13 }
 0x233   : > { %644 = vst [vmem:[%s1271_s8 + $0x68] sm:$0xff] %v628_v14 }
 0x234   : > { %974 = shalt.err (!%p971_p10)
}
 0x235   : > { %s1027_s5 = smov 256   ;;  %s1028_s7 = smov 16  }
 0x236   : > { %779 = dma.vmem_to_hbm [thread:$0]  (%p1111_p7), %s661_s22, 2048, %s663_s24, %s648_s25, %s1027_s5, %s1027_s5, %s1028_s7  }
 0x237 PF: > { %s677_s14 = sand.u32 1, %s1005_s9   ;;  %p1343_p12 = scmp.ge.s32.totalorder %s1017_s12, 2 }
 0x238   : > { %s678_s15 = scalar_lea.sflag [#allocation4], %s677_s14 }
 0x239   : > { %p790_p13 = pnand %p1343_p12, %p1079_p6 }
 0x23b   : > { %p791_p0 = pneg %p790_p13 }
 0x23d   : > { %1000 = dma.done.wait (%p791_p0), %s678_s15, 2048  }
 0x23e   : > { %1002 = vsyncadd (%p791_p0), %s678_s15, 4294965248  ;;  %p16_p3 = scmp.ge.s32.totalorder %s1097_s23, 4   ;;  %s1344_s9 = smov %s1009_s10 }
 0x23f   : > { %s1345_s10 = smov %s1013_s11  ;;  %s1346_s11 = smov %s1107_s28 }
 0x240   : > { %s1347_s12 = smov %s1097_s23  ;;  %18 = sbr.rel (!%p16_p3) target bundleno = 6 (0x6), region = 77 }
 0x245   :  { %684 = vsyncpa [#allocation3], 1 }
 0x246   :  { %686 = vsyncpa [#allocation3 + $0x1], 1 }
 0x247   :  { %687 = vsyncpa [#allocation6], 1 }
 0x248   :  { %688 = vsyncpa [#allocation4], 1 }
 0x249   :  { %690 = vsyncpa [#allocation4 + $0x1], 1 }

</bundles_post_ra>
